<compile_context>
chip_gen: v5e
topology: v5e:2x2
jax: 0.10.0
libtpu: 0.0.40
codegen_flags: <defaults>
</compile_context>

<pallas_src>
import math

import jax
import jax.numpy as jnp
from jax.experimental import pallas as pl
from jax.experimental.pallas import tpu as pltpu

_LN_EPS = 1e-5                      # PyTorch nn.LayerNorm default
_VMEM_LIMIT = 64 * 1024 * 1024      # raise scoped VMEM (v5e default is 16 MiB)
_COMPUTE_DTYPE = jnp.bfloat16       # pallas_call-boundary dtype (f32 math inside)


def _cparams(*sems):
    return pltpu.CompilerParams(
        dimension_semantics=tuple(sems), vmem_limit_bytes=_VMEM_LIMIT
    )


# --------------------------------------------------------------------------
# In-kernel helpers (all math in f32)
# --------------------------------------------------------------------------
def _layernorm(y, gamma, beta):
    mean = jnp.mean(y, axis=-1, keepdims=True)
    var = jnp.mean((y - mean) ** 2, axis=-1, keepdims=True)
    return (y - mean) * jax.lax.rsqrt(var + _LN_EPS) * gamma + beta


def _skew(qer):
    """Music-Transformer skew: srel[i, j] = qer[i, (j - i - 1) mod T].

    For the causal region (j <= i) this equals qer[i, T - 1 - i + j], i.e.
    q_i . Er[relative distance i - j].

    Primary path: one strided XLU rotation (row i rolled right by i + 1),
    O(1) kernel ops regardless of T.  For small, non-lane-aligned T (the demo
    config) we keep the proven slice/concat fallback, which is only a handful
    of ops there and avoids rotate-lowering constraints on sub-128 lane tiles.
    """
    T = qer.shape[0]
    if T % 128 == 0:
        # out[i, j] = qer[i, (j - (1 + i)) mod T]  -- exactly the skew.
        return pltpu.roll(qer, 1, 1, stride=1, stride_axis=0)

    rows = []
    for i in range(T):  # tiny static unroll (demo-sized T only)
        shift = (i + 1) % T
        row = qer[i : i + 1, :]
        if shift:
            row = jnp.concatenate([row[:, T - shift :], row[:, : T - shift]], axis=1)
        rows.append(row)
    return jnp.concatenate(rows, axis=0)


# --------------------------------------------------------------------------
# Pallas kernels
# --------------------------------------------------------------------------
def _matmul_bias_kernel(x_ref, w_ref, b_ref, o_ref):
    o_ref[...] = (
        jnp.dot(x_ref[...], w_ref[...], preferred_element_type=jnp.float32)
        + b_ref[...]
    ).astype(o_ref.dtype)


def _proj_res_ln_kernel(a_ref, w_ref, b_ref, r_ref, g_ref, bt_ref, o_ref):
    # o = LayerNorm(residual + a @ w + b); residual/LN math in f32.
    y = (
        jnp.dot(a_ref[...], w_ref[...], preferred_element_type=jnp.float32)
        + b_ref[...]
        + r_ref[...].astype(jnp.float32)
    )
    o_ref[...] = _layernorm(y, g_ref[...], bt_ref[...]).astype(o_ref.dtype)


def _ffn_res_ln_kernel(x_ref, w1_ref, b1_ref, w2_ref, b2_ref, g_ref, bt_ref,
                       o_ref, acc_ref):
    # o = LayerNorm(x + relu(x @ w1 + b1) @ w2 + b2), with the hidden dim F
    # tiled along grid axis 1 ("arbitrary") and an f32 VMEM accumulator, so
    # resident weights are O(D * tf) instead of O(D * F).
    f = pl.program_id(1)

    @pl.when(f == 0)
    def _():
        acc_ref[...] = jnp.zeros_like(acc_ref)

    h = jnp.maximum(
        jnp.dot(x_ref[...], w1_ref[...], preferred_element_type=jnp.float32)
        + b1_ref[...],
        0.0,
    )  # ReLU in f32 (v5e-friendly)
    acc_ref[...] += jnp.dot(
        h.astype(w2_ref.dtype), w2_ref[...], preferred_element_type=jnp.float32
    )

    @pl.when(f == pl.num_programs(1) - 1)
    def _():
        y = x_ref[...].astype(jnp.float32) + b2_ref[...] + acc_ref[...]
        o_ref[...] = _layernorm(y, g_ref[...], bt_ref[...]).astype(o_ref.dtype)


def _ln_kernel(x_ref, g_ref, b_ref, o_ref):
    o_ref[...] = _layernorm(
        x_ref[...].astype(jnp.float32), g_ref[...], b_ref[...]
    ).astype(o_ref.dtype)


def _attn_kernel(q_ref, k_ref, v_ref, er_ref, o_ref):
    # One (batch, head) per grid step.  Refs: q/k/v/er (T, Dh), o (T, Dh).
    # Q is already pre-scaled by 1/sqrt(Dh) (folded into the fused QKV weights).
    # Scores / softmax stay f32 (so the -1e9 mask fill is exact); only the
    # MXU inputs are bf16.
    T = q_ref.shape[0]
    q = q_ref[...]
    k = k_ref[...]
    v = v_ref[...]

    qk = jax.lax.dot_general(
        q, k, (((1,), (1,)), ((), ())), preferred_element_type=jnp.float32
    )  # (T, T): q_i . k_j
    qer = jax.lax.dot_general(
        q, er_ref[...], (((1,), (1,)), ((), ())), preferred_element_type=jnp.float32
    )  # (T, T): q_i . Er[r]
    srel = _skew(qer)

    row = jax.lax.broadcasted_iota(jnp.int32, (T, T), 0)
    col = jax.lax.broadcasted_iota(jnp.int32, (T, T), 1)
    scores = jnp.where(row >= col, qk + srel, -1e9)  # f32

    m = jnp.max(scores, axis=-1, keepdims=True)
    p = jnp.exp(scores - m)
    p = p * pl.reciprocal(jnp.sum(p, axis=-1, keepdims=True), approx=True)
    out = jnp.dot(p.astype(v.dtype), v, preferred_element_type=jnp.float32)
    o_ref[...] = out.astype(o_ref.dtype)


# --------------------------------------------------------------------------
# Pallas wrappers
# --------------------------------------------------------------------------
def _row_tile(m, cap=512):
    # Full extent for small arrays, otherwise a cap that is a multiple of 8/16.
    return m if m <= cap else cap


def linear(x, w, b, *, out_dtype=None, tm_cap=512, tn_cap=512):
    M, K = x.shape
    _, N = w.shape
    out_dtype = x.dtype if out_dtype is None else out_dtype
    tm = _row_tile(M, tm_cap)
    tn = N if N <= tn_cap else tn_cap  # multiple of 128 when actually tiled
    return pl.pallas_call(
        _matmul_bias_kernel,
        out_shape=jax.ShapeDtypeStruct((M, N), out_dtype),
        grid=(pl.cdiv(M, tm), pl.cdiv(N, tn)),
        in_specs=[
            pl.BlockSpec((tm, K), lambda i, j: (i, 0)),
            pl.BlockSpec((K, tn), lambda i, j: (0, j)),
            pl.BlockSpec((1, tn), lambda i, j: (0, j)),
        ],
        out_specs=pl.BlockSpec((tm, tn), lambda i, j: (i, j)),
        compiler_params=_cparams("parallel", "parallel"),
    )(x, w, b.reshape(1, N))


def proj_residual_layernorm(a, w, b, resid, gamma, beta, *, tm_cap=512):
    M, D = a.shape
    tm = _row_tile(M, tm_cap)
    return pl.pallas_call(
        _proj_res_ln_kernel,
        out_shape=jax.ShapeDtypeStruct((M, D), a.dtype),
        grid=(pl.cdiv(M, tm),),
        in_specs=[
            pl.BlockSpec((tm, D), lambda i: (i, 0)),
            pl.BlockSpec((D, D), lambda i: (0, 0)),
            pl.BlockSpec((1, D), lambda i: (0, 0)),
            pl.BlockSpec((tm, D), lambda i: (i, 0)),
            pl.BlockSpec((1, D), lambda i: (0, 0)),
            pl.BlockSpec((1, D), lambda i: (0, 0)),
        ],
        out_specs=pl.BlockSpec((tm, D), lambda i: (i, 0)),
        compiler_params=_cparams("parallel"),
    )(a, w, b.reshape(1, D), resid, gamma.reshape(1, D), beta.reshape(1, D))


def ffn_residual_layernorm(x, w1, b1, w2, b2, gamma, beta, *, tm_cap=512, tf_cap=512):
    M, D = x.shape
    F = w1.shape[1]
    tm = _row_tile(M, tm_cap)
    tf = F if F <= tf_cap else tf_cap  # multiple of 128 when actually tiled
    return pl.pallas_call(
        _ffn_res_ln_kernel,
        out_shape=jax.ShapeDtypeStruct((M, D), x.dtype),
        grid=(pl.cdiv(M, tm), pl.cdiv(F, tf)),
        in_specs=[
            pl.BlockSpec((tm, D), lambda i, f: (i, 0)),   # resident across f
            pl.BlockSpec((D, tf), lambda i, f: (0, f)),
            pl.BlockSpec((1, tf), lambda i, f: (0, f)),
            pl.BlockSpec((tf, D), lambda i, f: (f, 0)),
            pl.BlockSpec((1, D), lambda i, f: (0, 0)),
            pl.BlockSpec((1, D), lambda i, f: (0, 0)),
            pl.BlockSpec((1, D), lambda i, f: (0, 0)),
        ],
        out_specs=pl.BlockSpec((tm, D), lambda i, f: (i, 0)),
        scratch_shapes=[pltpu.VMEM((tm, D), jnp.float32)],
        compiler_params=_cparams("parallel", "arbitrary"),
    )(
        x, w1, b1.reshape(1, F), w2, b2.reshape(1, D),
        gamma.reshape(1, D), beta.reshape(1, D),
    )


def layernorm(x, gamma, beta, *, tm_cap=512):
    M, D = x.shape
    tm = _row_tile(M, tm_cap)
    return pl.pallas_call(
        _ln_kernel,
        out_shape=jax.ShapeDtypeStruct((M, D), x.dtype),
        grid=(pl.cdiv(M, tm),),
        in_specs=[
            pl.BlockSpec((tm, D), lambda i: (i, 0)),
            pl.BlockSpec((1, D), lambda i: (0, 0)),
            pl.BlockSpec((1, D), lambda i: (0, 0)),
        ],
        out_specs=pl.BlockSpec((tm, D), lambda i: (i, 0)),
        compiler_params=_cparams("parallel"),
    )(x, gamma.reshape(1, D), beta.reshape(1, D))


def relative_attention(q, k, v, er):
    # q, k, v: (B, H, T, Dh); er: (T, Dh) shared across heads.
    B, H, T, Dh = q.shape
    qkv_spec = lambda: pl.BlockSpec((None, None, T, Dh), lambda b, h: (b, h, 0, 0))
    return pl.pallas_call(
        _attn_kernel,
        out_shape=jax.ShapeDtypeStruct((B, H, T, Dh), q.dtype),
        grid=(B, H),
        in_specs=[
            qkv_spec(),
            qkv_spec(),
            qkv_spec(),
            pl.BlockSpec((T, Dh), lambda b, h: (0, 0)),
        ],
        out_specs=pl.BlockSpec((None, None, T, Dh), lambda b, h: (b, h, 0, 0)),
        compiler_params=_cparams("parallel", "parallel"),
    )(q, k, v, er)


# --------------------------------------------------------------------------
# Parameter init (deterministic, synthetic).  Matmul weights are stored in the
# boundary compute dtype (bf16); biases / LN params / embedding stay f32.
# The fused QKV weight (with the 1/sqrt(Dh) scale folded into Q) is built HERE,
# once, not per forward call.
# --------------------------------------------------------------------------
def init_params(key, vocab_size, d_model, n_heads, num_layers, d_ff, max_len,
                compute_dtype=_COMPUTE_DTYPE):
    assert d_model % n_heads == 0
    d_head = d_model // n_heads
    scale = 1.0 / math.sqrt(d_head)
    cd = compute_dtype
    keys = iter(jax.random.split(key, 4 + num_layers * 8))

    def w(shape, s=0.02):
        return s * jax.random.normal(next(keys), shape, dtype=jnp.float32)

    params = {
        "max_len": max_len,
        "compute_dtype": cd,
        "tok_emb": w((vocab_size, d_model)),
        "ln_g": jnp.ones((d_model,), jnp.float32),
        "ln_b": jnp.zeros((d_model,), jnp.float32),
        "w_out": w((d_model, vocab_size)).astype(cd),
        "b_out": jnp.zeros((vocab_size,), jnp.float32),
        "layers": [],
    }
    for _ in range(num_layers):
        wq, wk, wv = w((d_model, d_model)), w((d_model, d_model)), w((d_model, d_model))
        bq = bk = bv = jnp.zeros((d_model,), jnp.float32)
        lp = {
            "w_qkv": jnp.concatenate([wq * scale, wk, wv], axis=1).astype(cd),
            "b_qkv": jnp.concatenate([bq * scale, bk, bv]),
            "wo": w((d_model, d_model)).astype(cd),
            "bo": jnp.zeros((d_model,), jnp.float32),
            "er": w((max_len, d_head)).astype(cd),  # shared relative embedding
            "ln1_g": jnp.ones((d_model,), jnp.float32),
            "ln1_b": jnp.zeros((d_model,), jnp.float32),
            "w1": w((d_model, d_ff)).astype(cd),
            "b1": jnp.zeros((d_ff,), jnp.float32),
            "w2": w((d_ff, d_model)).astype(cd),
            "b2": jnp.zeros((d_model,), jnp.float32),
            "ln2_g": jnp.ones((d_model,), jnp.float32),
            "ln2_b": jnp.zeros((d_model,), jnp.float32),
        }
        params["layers"].append(lp)
    return params


# --------------------------------------------------------------------------
# Forward pass
# --------------------------------------------------------------------------
def music_transformer_forward(tokens, params, n_heads):
    B, T = tokens.shape
    assert T <= params["max_len"]
    cd = params["compute_dtype"]

    emb = jnp.take(params["tok_emb"], tokens, axis=0)  # (B, T, D) gather (XLA glue)
    D = emb.shape[-1]
    H = n_heads
    Dh = D // H

    x = emb.astype(cd).reshape(B * T, D)  # residual stream in bf16
    for lp in params["layers"]:
        # Fused QKV projection (scale already folded into the Q columns).
        qkv = linear(x, lp["w_qkv"], lp["b_qkv"])  # (B*T, 3D)

        # Layout plumbing (XLA): per-head (T, Dh) slabs so the attention kernel
        # gets full-extent blocks and never slices / concatenates lanes.
        qkv = qkv.reshape(B, T, 3, H, Dh).transpose(2, 0, 3, 1, 4)  # (3,B,H,T,Dh)
        er = lp["er"][params["max_len"] - T :]  # (T, Dh), distances T-1 .. 0

        attn = relative_attention(qkv[0], qkv[1], qkv[2], er)  # (B, H, T, Dh)
        attn = attn.transpose(0, 2, 1, 3).reshape(B * T, D)

        # x = LN1(x + attn @ wo + bo)   (dropout = identity)
        x = proj_residual_layernorm(
            attn, lp["wo"], lp["bo"], x, lp["ln1_g"], lp["ln1_b"]
        )
        # x = LN2(x + FFN(x))           (dropout = identity)
        x = ffn_residual_layernorm(
            x, lp["w1"], lp["b1"], lp["w2"], lp["b2"], lp["ln2_g"], lp["ln2_b"]
        )

    # Final LayerNorm + vocab projection (f32 logits).
    x = layernorm(x, params["ln_g"], params["ln_b"])
    logits = linear(x, params["w_out"], params["b_out"], out_dtype=jnp.float32)
    return logits.reshape(B, T, -1)


# --------------------------------------------------------------------------
if __name__ == "__main__":
    VOCAB = 50
    D_MODEL = 32
    N_HEADS = 4
    N_LAYERS = 2
    D_FF = 64
    MAX_LEN = 64
    B, T = 2, 8

    key = jax.random.PRNGKey(0)
    pkey, tkey = jax.random.split(key)
    params = init_params(pkey, VOCAB, D_MODEL, N_HEADS, N_LAYERS, D_FF, MAX_LEN)
    tokens = jax.random.randint(tkey, (B, T), 0, VOCAB, dtype=jnp.int32)

    logits = music_transformer_forward(tokens, params, N_HEADS)
    logits = jax.block_until_ready(logits)

    assert logits.shape == (B, T, VOCAB), logits.shape
    assert bool(jnp.all(jnp.isfinite(logits)))
    print("KERNEL_OK")
</pallas_src>

<mosaic_0001>
module attributes {stable_mosaic.version = 11 : i64} {
  func.func @_matmul_bias_kernel(%arg0: i32, %arg1: i32, %arg2: memref<16x32xbf16, #tpu.memory_space<vmem>>, %arg3: memref<32x96xbf16, #tpu.memory_space<vmem>>, %arg4: memref<1x96xf32, #tpu.memory_space<vmem>>, %arg5: memref<16x96xbf16, #tpu.memory_space<vmem>>) attributes {dimension_semantics = [#tpu.dimension_semantics<parallel>, #tpu.dimension_semantics<parallel>], iteration_bounds = array<i64: 1, 1>, scalar_prefetch = 0 : i64, scratch_operands = 0 : i64, tpu.core_type = #tpu.core_type<tc>, window_params = [{transform_indices = @transform_0, window_bounds = array<i64: 16, 32>}, {transform_indices = @transform_1, window_bounds = array<i64: 32, 96>}, {transform_indices = @transform_2, window_bounds = array<i64: 1, 96>}, {transform_indices = @transform_3, window_bounds = array<i64: 16, 96>}]} {
    %c0 = arith.constant 0 : index
    %c0_0 = arith.constant 0 : index
    %0 = vector.load %arg2[%c0, %c0_0] : memref<16x32xbf16, #tpu.memory_space<vmem>>, vector<16x32xbf16>
    %c0_1 = arith.constant 0 : index
    %c0_2 = arith.constant 0 : index
    %1 = vector.load %arg3[%c0_1, %c0_2] : memref<32x96xbf16, #tpu.memory_space<vmem>>, vector<32x96xbf16>
    %cst = arith.constant dense<0.000000e+00> : vector<16x96xf32>
    %2 = tpu.matmul %0, %1, %cst {dimension_numbers = #tpu.dot_dimension_numbers<[1], [0], [0], [1], [0, 0, 1, 1], [], []>} : vector<16x32xbf16>, vector<32x96xbf16>, vector<16x96xf32> -> vector<16x96xf32>
    %c0_3 = arith.constant 0 : index
    %c0_4 = arith.constant 0 : index
    %3 = vector.load %arg4[%c0_3, %c0_4] : memref<1x96xf32, #tpu.memory_space<vmem>>, vector<1x96xf32>
    %4 = vector.broadcast %3 : vector<1x96xf32> to vector<16x96xf32>
    %5 = arith.addf %2, %4 : vector<16x96xf32>
    %6 = arith.truncf %5 : vector<16x96xf32> to vector<16x96xbf16>
    %c0_5 = arith.constant 0 : index
    %c0_6 = arith.constant 0 : index
    %7 = vector.load %arg5[%c0_5, %c0_6] : memref<16x96xbf16, #tpu.memory_space<vmem>>, vector<16x96xbf16>
    tpu.vector_store %arg5[%c0_5, %c0_6], %6 {strides = array<i32>} : memref<16x96xbf16, #tpu.memory_space<vmem>>, vector<16x96xbf16>,
    return
  }
  func.func @transform_0(%arg0: i32, %arg1: i32) -> (i32, i32) {
    %c0_i32 = arith.constant 0 : i32
    %c0_i32_0 = arith.constant 0 : i32
    return %arg0, %c0_i32 : i32, i32
  }
  func.func @transform_1(%arg0: i32, %arg1: i32) -> (i32, i32) {
    %c0_i32 = arith.constant 0 : i32
    %c0_i32_0 = arith.constant 0 : i32
    return %c0_i32, %arg1 : i32, i32
  }
  func.func @transform_2(%arg0: i32, %arg1: i32) -> (i32, i32) {
    %c0_i32 = arith.constant 0 : i32
    %c0_i32_0 = arith.constant 0 : i32
    return %c0_i32, %arg1 : i32, i32
  }
  func.func @transform_3(%arg0: i32, %arg1: i32) -> (i32, i32) {
    %c0_i32 = arith.constant 0 : i32
    return %arg0, %arg1 : i32, i32
  }
}

</mosaic_0001>

<bundles_post_ra>
// kernel: tpu_custom_call.1
= control target key start
LH: loop header
LB: loop body
LE: loop exit
PB: predicated region body
PF: predicated region fallthrough
CT: control target
= control target key end

     0   :  { %8 = vsyncpa [#allocation3], 0  ;;  %s264_s0 = inlined_call_operand.hbm [shape: bf16[16,32], index: 0, kind: input, shape index: {}]   ;;  %s265_s1 = inlined_call_operand.hbm [shape: bf16[32,96], index: 1, kind: input, shape index: {}]   ;;  %s266_s2 = inlined_call_operand.vmem [shape: f32[1,96], index: 2, kind: input, shape index: {}]   ;;  %s267_s3 = inlined_call_operand.hbm [shape: bf16[16,96], index: 3, kind: output, shape index: {}]  }
   0x1   :  { %9 = vsyncpa [#allocation6], 0 }
   0x2   :  { %10 = vsyncpa [#allocation4], 0  ;;  %s15_s14 = sshll.u32 %s264_s0, 4  ;;  %s218_s15 = smov [#allocation2]   ;;  %s16_s14 = int_to_ptr.hbm [resolvable:$true] %s15_s14 }
   0x3   :  { %s17_s16 = sshll.u32 %s218_s15, 4  ;;  %s28_s19 = sshll.u32 %s265_s1, 4  ;;  %s18_s16 = int_to_ptr.vmem [resolvable:$true] %s17_s16  ;;  %s29_s19 = int_to_ptr.hbm [resolvable:$true] %s28_s19 }
   0x4   :  { %s219_s20 = smov 64   ;;  %s220_s21 = smov 4  }
   0x5   :  { %23 = dma.hbm_to_vmem [thread:$0]  %s16_s14, 128, %s18_s16, [#allocation3], %s219_s20, %s219_s20, %s220_s21  }
   0x6   :  { %s221_s22 = smov [#allocation5]  }
   0x7   :  { %s30_s23 = sshll.u32 %s221_s22, 4  ;;  %s31_s23 = int_to_ptr.vmem [resolvable:$true] %s30_s23 }
   0x8   :  { %36 = dma.hbm_to_vmem [thread:$0]  %s29_s19, 256, %s31_s23, [#allocation6], %s219_s20, %s219_s20, %s220_s21  }
   0x9   :  { %212 = dma.done.wait [#allocation3], 128  }
   0xa   :  { %213 = vsyncadd [#allocation3], 4294967168 }
   0xb   :  { %214 = dma.done.wait [#allocation6], 256  }
   0xc   :  { %215 = vsyncadd [#allocation6], 4294967040  ;;  %v133_v0 = vld [vmem:[#allocation5 + $0x8] sm:$0xff]  ;;  %v132_v1 = vld [vmem:[#allocation5] sm:$0xff]  ;;  %vm75_vm0 = vcmask 261120   ;;  %vm95_vm1 = vcmask 781312  }
   0xd   :  { %85 = vmatpush.bf16.msra.mxu0 %v133_v0  ;;  %v131_v2 = vld [vmem:[#allocation2] sm:$0xff]  ;;  %s222_s24 = smov [#allocation7]   ;;  %s104_s28 = sshll.u32 %s267_s3, 4  ;;  %s105_s28 = int_to_ptr.hbm [resolvable:$true] %s104_s28 }
   0xe   :  { %v139_v3 = vld [vmem:[%s266_s2] ss:$0 sm:$0xff]  ;;  %s102_s25 = sshll.u32 %s222_s24, 4  ;;  %s103_s25 = int_to_ptr.vmem [resolvable:$true] %s102_s25 }
  0x11   :  { %86 = vmatpush.bf16.msra.mxu0 %v132_v1 }
  0x14   :  { %130 = vmatmul.msk.bf16.vlgmr.msra.gmra.mxu0 %vm75_vm0, %v131_v2 }
  0x91   :  { %v88_v4 = vpop.f32.mrf.mxu0 }
  0x92   :  { %v89_v5 = vadd.f32 %v139_v3, %v88_v4 }
  0x94   :  { %v93_v6 = vpack.c.bf16 %v89_v5, %v89_v5 }
  0x96   :  { %96 = vst.msk [vmem:[#allocation7] sm:$0xf] %vm95_vm1, %v93_v6 }
  0x99   :  { %v90_v7 = vpop.f32.mrf.mxu0 }
  0x9a   :  { %v91_v8 = vadd.f32 %v139_v3, %v90_v7 }
  0x9c   :  { %v94_v9 = vpack.c.bf16 %v91_v8, %v91_v8 }
  0x9e   :  { %97 = vst.msk [vmem:[#allocation7 + $0x4] sm:$0xf] %vm95_vm1, %v94_v9 }
  0x9f   :  { %110 = dma.vmem_to_hbm [thread:$0]  %s103_s25, 128, %s105_s28, [#allocation4], %s219_s20, %s219_s20, %s220_s21  }
  0xa0   :  { %216 = dma.done.wait [#allocation4], 128  }
  0xa1   :  { %217 = vsyncadd [#allocation4], 4294967168 }
  0xa2   :  { %115 = vsyncpa [#allocation3], 1 }
  0xa3   :  { %116 = vsyncpa [#allocation6], 1 }
  0xa4   :  { %117 = vsyncpa [#allocation4], 1 }

</bundles_post_ra>
